<compile_context>
chip_gen: v6e
topology: v6e:2x2x1
jax: 0.10.0
libtpu: 0.0.40
codegen_flags: <defaults>
</compile_context>

<pallas_src>
import math
import functools

import jax
import jax.numpy as jnp
from jax.experimental import pallas as pl
from jax.experimental.pallas import tpu as pltpu


# ---------------------------------------------------------------------------
# Kernels
# ---------------------------------------------------------------------------
def _pe_add_kernel(x_ref, pe_ref, o_ref):
    """Eval-mode forward: out = x + pe (dropout is identity in eval)."""
    o_ref[...] = x_ref[...] + pe_ref[...]


def _pe_add_dropout_kernel(x_ref, pe_ref, bits_ref, o_ref, *, threshold, scale):
    """Train-mode forward: out = inverted-dropout(x + pe, p).

    bits_ref holds uniform integers in [0, 2^24); an element is dropped iff
    bits < threshold (threshold = round(p * 2^24)).  Kept elements are scaled
    by 1/(1-p).  Integer threshold compare keeps the VPU cost minimal and the
    kernel HBM-bound on all generations.
    """
    y = x_ref[...] + pe_ref[...]
    keep = bits_ref[...] >= jnp.int32(threshold)
    scale_c = jnp.asarray(scale, dtype=y.dtype)
    o_ref[...] = jnp.where(keep, y * scale_c, jnp.zeros_like(y))


# ---------------------------------------------------------------------------
# Parameter setup (the registered `pe` buffer), done once in plain JAX
# ---------------------------------------------------------------------------
def make_pe_buffer(d_model: int, max_len: int = 5000) -> jax.Array:
    position = jnp.arange(max_len, dtype=jnp.float32)[:, None]            # [max_len, 1]
    div_term = jnp.exp(
        jnp.arange(0, d_model, 2, dtype=jnp.float32) * (-math.log(10000.0) / d_model)
    )                                                                     # [d_model/2]
    pe = jnp.zeros((max_len, 1, d_model), dtype=jnp.float32)
    pe = pe.at[:, 0, 0::2].set(jnp.sin(position * div_term))
    pe = pe.at[:, 0, 1::2].set(jnp.cos(position * div_term))
    return pe


# ---------------------------------------------------------------------------
# Tiling heuristic
# ---------------------------------------------------------------------------
def _auto_seq_tile(S: int, row_bytes: int, target_bytes: int = 2 * 1024 * 1024) -> int:
    """Pick a seq tile so each x block is ~target_bytes.

    Prefers a multiple of 8 (sublane-dense) that divides S so every block is
    full-size.  Falls back to the whole sequence for small / awkward S.
    With ~2 MiB per input block, the double-buffered working set
    (2*x + 2*pe + 2*bits + 2*out) stays well under 32 MiB -> safe on v7x's
    64 MiB VMEM and within the raised scoped limit on v5e/v6e.
    """
    t = max(1, min(S, target_bytes // max(row_bytes, 1)))
    if t >= 8:
        t -= t % 8
        while t >= 8 and S % t != 0:
            t -= 8
    if t < 8 or S % t != 0:
        t = S
    return t


# ---------------------------------------------------------------------------
# Wrapper
# ---------------------------------------------------------------------------
def positional_encoding(
    x: jax.Array,
    pe: jax.Array,
    *,
    p_drop: float = 0.1,
    training: bool = False,
    seed: int = 0,
    seq_tile: int | None = None,
) -> jax.Array:
    """Pallas forward of PositionalEncoding.

    x : [S, B, D] float32
    pe: [max_len, 1, D] float32 (precomputed buffer)
    """
    S, B, D = x.shape
    BD = B * D

    # Lane/sublane-dense 2D view.  pe is broadcast over batch once, outside
    # the kernel, so the kernel streams plain same-shaped slabs.
    x2 = x.reshape(S, BD)
    pe2 = jnp.broadcast_to(pe[:S], (S, B, D)).reshape(S, BD).astype(x.dtype)

    ts = seq_tile if seq_tile is not None else _auto_seq_tile(S, BD * x.dtype.itemsize)
    assert S % ts == 0, "seq_len must be divisible by the seq tile"
    grid = (S // ts,)

    blk = pl.BlockSpec((ts, BD), lambda i: (i, 0))
    out_shape = jax.ShapeDtypeStruct((S, BD), x.dtype)
    cparams = pltpu.CompilerParams(
        dimension_semantics=("parallel",),        # shards across v7x's 2 TCs
        vmem_limit_bytes=32 * 1024 * 1024,        # raise v5e's 16 MiB default
    )

    if training and p_drop >= 1.0:
        return jnp.zeros_like(x)

    if training and p_drop > 0.0:
        # Uniform 24-bit integers in [0, 2^24) (signed-compare friendly).
        key = jax.random.PRNGKey(seed)
        rbits = jax.lax.shift_right_logical(
            jax.random.bits(key, (S, BD), dtype=jnp.uint32), jnp.uint32(8)
        ).astype(jnp.int32)
        threshold = int(round(p_drop * float(1 << 24)))
        scale = 1.0 / (1.0 - p_drop)
        kernel = functools.partial(
            _pe_add_dropout_kernel, threshold=threshold, scale=scale
        )
        out2 = pl.pallas_call(
            kernel,
            out_shape=out_shape,
            grid=grid,
            in_specs=[blk, blk, blk],
            out_specs=blk,
            compiler_params=cparams,
        )(x2, pe2, rbits)
    else:
        # eval mode: dropout is identity
        out2 = pl.pallas_call(
            _pe_add_kernel,
            out_shape=out_shape,
            grid=grid,
            in_specs=[blk, blk],
            out_specs=blk,
            compiler_params=cparams,
        )(x2, pe2)

    return out2.reshape(S, B, D)


# ---------------------------------------------------------------------------
# Demo / self-test
# ---------------------------------------------------------------------------
if __name__ == "__main__":
    d_model = 32
    seq_len = 8
    batch = 2
    max_len = 64  # small max_len for the demo buffer (module default is 5000)

    key = jax.random.PRNGKey(0)
    x = jax.random.normal(key, (seq_len, batch, d_model), dtype=jnp.float32)

    pe = make_pe_buffer(d_model, max_len=max_len)

    # Eval-mode forward (dropout == identity), exactly matches PyTorch .eval()
    out = positional_encoding(x, pe, p_drop=0.1, training=False)
    out = jax.block_until_ready(out)

    ref = x + pe[:seq_len]
    assert out.shape == (seq_len, batch, d_model)
    assert jnp.allclose(out, ref, atol=1e-6), "eval mismatch vs. reference"

    # Train-mode path (inverted dropout).  Random stream cannot bit-match
    # torch's RNG; semantics (drop w.p. p, scale kept by 1/(1-p)) match.
    p = 0.1
    out_train = positional_encoding(x, pe, p_drop=p, training=True, seed=123)
    out_train = jax.block_until_ready(out_train)
    assert out_train.shape == (seq_len, batch, d_model)

    scale = 1.0 / (1.0 - p)
    kept = out_train != 0
    # Every kept element must equal (x + pe) * scale.
    assert jnp.allclose(
        jnp.where(kept, out_train, ref * scale), ref * scale, atol=1e-5
    ), "train-mode kept values mismatch"
    drop_frac = 1.0 - float(jnp.mean(kept.astype(jnp.float32)))
    assert 0.0 <= drop_frac <= 0.4, f"implausible drop fraction {drop_frac}"

    print("KERNEL_OK")
</pallas_src>

<mosaic_0001>
module attributes {stable_mosaic.version = 11 : i64} {
  func.func @_pe_add_kernel(%arg0: i32, %arg1: memref<8x64xf32, #tpu.memory_space<vmem>>, %arg2: memref<8x64xf32, #tpu.memory_space<vmem>>, %arg3: memref<8x64xf32, #tpu.memory_space<vmem>>) attributes {dimension_semantics = [#tpu.dimension_semantics<parallel>], iteration_bounds = array<i64: 1>, scalar_prefetch = 0 : i64, scratch_operands = 0 : i64, tpu.core_type = #tpu.core_type<tc>, window_params = [{transform_indices = @transform_0, window_bounds = array<i64: 8, 64>}, {transform_indices = @transform_1, window_bounds = array<i64: 8, 64>}, {transform_indices = @transform_2, window_bounds = array<i64: 8, 64>}]} {
    %c0 = arith.constant 0 : index
    %c0_0 = arith.constant 0 : index
    %0 = vector.load %arg1[%c0, %c0_0] : memref<8x64xf32, #tpu.memory_space<vmem>>, vector<8x64xf32>
    %c0_1 = arith.constant 0 : index
    %c0_2 = arith.constant 0 : index
    %1 = vector.load %arg2[%c0_1, %c0_2] : memref<8x64xf32, #tpu.memory_space<vmem>>, vector<8x64xf32>
    %2 = arith.addf %0, %1 : vector<8x64xf32>
    %c0_3 = arith.constant 0 : index
    %c0_4 = arith.constant 0 : index
    %3 = vector.load %arg3[%c0_3, %c0_4] : memref<8x64xf32, #tpu.memory_space<vmem>>, vector<8x64xf32>
    tpu.vector_store %arg3[%c0_3, %c0_4], %2 {strides = array<i32>} : memref<8x64xf32, #tpu.memory_space<vmem>>, vector<8x64xf32>,
    return
  }
  func.func @transform_0(%arg0: i32) -> (i32, i32) {
    %c0_i32 = arith.constant 0 : i32
    %c0_i32_0 = arith.constant 0 : i32
    return %arg0, %c0_i32 : i32, i32
  }
  func.func @transform_1(%arg0: i32) -> (i32, i32) {
    %c0_i32 = arith.constant 0 : i32
    %c0_i32_0 = arith.constant 0 : i32
    return %arg0, %c0_i32 : i32, i32
  }
  func.func @transform_2(%arg0: i32) -> (i32, i32) {
    %c0_i32 = arith.constant 0 : i32
    %c0_i32_0 = arith.constant 0 : i32
    return %arg0, %c0_i32 : i32, i32
  }
}

</mosaic_0001>

<bundles_post_ra>
// kernel: tpu_custom_call.1
= control target key start
LH: loop header
LB: loop body
LE: loop exit
PB: predicated region body
PF: predicated region fallthrough
CT: control target
= control target key end

     0   :  { %7 = vsyncpa [#allocation3], 0  ;;  %s153_s0 = inlined_call_operand.hbm [shape: f32[8,64], index: 0, kind: input, shape index: {}]   ;;  %s154_s1 = inlined_call_operand.hbm [shape: f32[8,64], index: 1, kind: input, shape index: {}]   ;;  %s155_s2 = inlined_call_operand.hbm [shape: f32[8,64], index: 2, kind: output, shape index: {}]  }
   0x1   :  { %8 = vsyncpa [#allocation6], 0 }
   0x2   :  { %9 = vsyncpa [#allocation4], 0  ;;  %s126_s9 = smov [#allocation2]   ;;  %s127_s11 = smov [#allocation5]  }
   0x3   :  { %s16_s10 = sshll.u32 %s126_s9, 4  ;;  %s26_s12 = sshll.u32 %s127_s11, 4  ;;  %s17_s10 = int_to_ptr.vmem [resolvable:$true] %s16_s10  ;;  %s27_s12 = int_to_ptr.vmem [resolvable:$true] %s26_s12 }
   0x4   :  { %s68_s13 = scalar_lea.vmem %s17_s10, 128  ;;  %p73_p1 = scmp.lt.s32.totalorder %s17_s10, %s17_s10 }
   0x5   :  { %p69_p0 = scmp.ne.s32.totalorder %s17_s10, %s68_s13  ;;  %p74_p2 = scmp.lt.s32.totalorder %s68_s13, %s68_s13 }
   0x7   :  { %p75_p3 = por %p74_p2, %p73_p1 }
   0x9   :  { %p76_p4 = pnand %p75_p3, %p69_p0 }
   0xb   :  { %79 = shalt.err (!%p76_p4)
}
   0xc   :  { %19 = dma.hbm_to_vmem [thread:$0]  %s153_s0, 128, %s17_s10, [#allocation3]  }
   0xd   :  { %s88_s16 = scalar_lea.vmem %s27_s12, 128  ;;  %p93_p6 = scmp.lt.s32.totalorder %s27_s12, %s27_s12 }
   0xe   :  { %p89_p5 = scmp.ne.s32.totalorder %s27_s12, %s88_s16  ;;  %p94_p7 = scmp.lt.s32.totalorder %s88_s16, %s88_s16 }
  0x10   :  { %p95_p8 = por %p94_p7, %p93_p6 }
  0x12   :  { %p96_p9 = pnand %p95_p8, %p89_p5 }
  0x14   :  { %99 = shalt.err (!%p96_p9)
}
  0x15   :  { %29 = dma.hbm_to_vmem [thread:$0]  %s154_s1, 128, %s27_s12, [#allocation6]  }
  0x16   :  { %120 = dma.done.wait [#allocation3], 128  }
  0x17   :  { %121 = vsyncadd [#allocation3], 4294967168 }
  0x18   :  { %122 = dma.done.wait [#allocation6], 128  }
  0x19   :  { %123 = vsyncadd [#allocation6], 4294967168  ;;  %s128_s19 = smov [#allocation7]   ;;  %v36_v0 = vld [vmem:[#allocation2] sm:$0xff]  ;;  %v37_v1 = vld [vmem:[#allocation5] sm:$0xff]  ;;  %vm39_vm0 = vcmask 523264  }
  0x1a   :  { %s47_s20 = sshll.u32 %s128_s19, 4  ;;  %v38_v2 = vadd.f32 %v37_v1, %v36_v0  ;;  %s48_s20 = int_to_ptr.vmem [resolvable:$true] %s47_s20 }
  0x1b   :  { %s100_s0 = scalar_lea.vmem %s48_s20, 128  ;;  %p105_p11 = scmp.lt.s32.totalorder %s48_s20, %s48_s20 }
  0x1c   :  { %40 = vst.msk [vmem:[#allocation7] sm:$0xff] %vm39_vm0, %v38_v2  ;;  %p101_p10 = scmp.ne.s32.totalorder %s48_s20, %s100_s0  ;;  %p106_p12 = scmp.lt.s32.totalorder %s100_s0, %s100_s0 }
  0x1e   :  { %p107_p13 = por %p106_p12, %p105_p11 }
  0x20   :  { %p108_p0 = pnand %p107_p13, %p101_p10 }
  0x22   :  { %111 = shalt.err (!%p108_p0)
}
  0x23   :  { %50 = dma.vmem_to_hbm [thread:$0]  %s48_s20, 128, %s155_s2, [#allocation4]  }
  0x24   :  { %124 = dma.done.wait [#allocation4], 128  }
  0x25   :  { %125 = vsyncadd [#allocation4], 4294967168 }
  0x26   :  { %54 = vsyncpa [#allocation3], 1 }
  0x27   :  { %55 = vsyncpa [#allocation6], 1 }
  0x28   :  { %56 = vsyncpa [#allocation4], 1 }

</bundles_post_ra>
